<compile_context>
chip_gen: v5e
topology: v5e:2x2
jax: 0.10.0
libtpu: 0.0.40
codegen_flags: <defaults>
</compile_context>

<pallas_src>
import functools

import jax
import jax.numpy as jnp
import numpy as np
from jax.experimental import pallas as pl
from jax.experimental.pallas import tpu as pltpu

_LANES = 128
# Target bytes per VMEM block buffer. 2 MiB/buffer * (in + out) * double
# buffering ~= 8 MiB, comfortably inside the default scoped VMEM limit on
# v5e (16 MiB), v6e (32 MiB) and v7x (32 MiB scoped / 64 MiB physical).
_TARGET_BLOCK_BYTES = 2 * 1024 * 1024


def _lambda_kernel(*refs, func, n_dyn, rebuild):
    # refs = (scalar SMEM refs..., x_ref, o_ref)
    dyn_vals = [refs[i][0] for i in range(n_dyn)]   # 0-d scalars from SMEM
    x_ref = refs[n_dyn]
    o_ref = refs[n_dyn + 1]
    args, kwargs = rebuild(dyn_vals)
    # Elementwise hot path on the VPU: apply the wrapped func to the VMEM tile.
    o_ref[...] = func(x_ref[...], *args, **kwargs).astype(o_ref.dtype)


def _split_extras(extra_args, extra_kwargs):
    """Split extras into traced 0-d scalars (passed via SMEM) and static values."""
    dyn_vals = []

    def classify(v):
        if isinstance(v, (jax.Array, np.ndarray, np.generic)) and np.ndim(v) == 0:
            dyn_vals.append(v)
            return len(dyn_vals) - 1          # index into dyn_vals
        # Python scalars / non-scalar arrays stay as closure constants.
        # TODO(synk): non-scalar array extras are baked as constants.
        return ("static", v)

    arg_slots = tuple(classify(a) for a in extra_args)
    kw_slots = {k: classify(v) for k, v in extra_kwargs.items()}

    def rebuild(vals):
        args = tuple(vals[s] if isinstance(s, int) else s[1] for s in arg_slots)
        kwargs = {k: (vals[s] if isinstance(s, int) else s[1])
                  for k, s in kw_slots.items()}
        return args, kwargs

    return dyn_vals, rebuild


class PallasLambda:
    """Pallas equivalent of kindling.utils.Lambda for elementwise `func`s."""

    def __init__(self, func, extra_args=(), extra_kwargs=None):
        self.func = func
        self.extra_args = tuple(extra_args)
        self.extra_kwargs = dict(extra_kwargs or {})
        self._dyn_vals, self._rebuild = _split_extras(
            self.extra_args, self.extra_kwargs)
        self._compiled = {}   # (shape, dtype) -> jitted callable

    # -------------------------- builder (per shape/dtype) -----------------
    def _build(self, shape, in_dtype):
        n = int(np.prod(shape)) if len(shape) else 1
        n_pad = (-n) % _LANES
        rows = (n + n_pad) // _LANES

        # Output dtype / elementwise sanity check via abstract evaluation.
        out_abs = jax.eval_shape(
            lambda v: self.func(v, *self.extra_args, **self.extra_kwargs),
            jax.ShapeDtypeStruct((rows, _LANES), in_dtype),
        )
        assert out_abs.shape == (rows, _LANES), (
            "PallasLambda only supports elementwise funcs")
        out_dtype = out_abs.dtype

        # ---- dtype-aware block / grid selection ----
        itemsize = max(jnp.dtype(in_dtype).itemsize, jnp.dtype(out_dtype).itemsize)
        max_rows = max(8, (_TARGET_BLOCK_BYTES // (_LANES * itemsize)) // 8 * 8)
        if rows <= max_rows:
            # Single block covering the whole slab (full-extent block is exempt
            # from the (8,128) divisibility rule): no grid-step overhead.
            block_rows = rows
            grid = (1,)
        else:
            block_rows = max_rows
            grid = (pl.cdiv(rows, block_rows),)   # remainder handled by Pallas

        n_dyn = len(self._dyn_vals)
        scalar_specs = [pl.BlockSpec(memory_space=pltpu.MemorySpace.SMEM)
                        for _ in range(n_dyn)]
        kernel = functools.partial(
            _lambda_kernel, func=self.func, n_dyn=n_dyn, rebuild=self._rebuild)

        call = pl.pallas_call(
            kernel,
            out_shape=jax.ShapeDtypeStruct((rows, _LANES), out_dtype),
            grid_spec=pltpu.PrefetchScalarGridSpec(
                num_scalar_prefetch=0,
                grid=grid,
                in_specs=scalar_specs + [
                    pl.BlockSpec((block_rows, _LANES), lambda i: (i, 0))],
                out_specs=pl.BlockSpec((block_rows, _LANES), lambda i: (i, 0)),
            ),
            compiler_params=pltpu.CompilerParams(
                dimension_semantics=("parallel",)),
        )

        def run(x, *scalars):
            # glue: flatten to lane-dense [rows, 128]; pad only if needed.
            flat = x.reshape(-1)
            if n_pad:
                flat = jnp.pad(flat, (0, n_pad))
            slab = flat.reshape(rows, _LANES)
            out_slab = call(*scalars, slab)
            out = out_slab.reshape(-1)
            if n_pad:
                out = out[:n]
            return out.reshape(shape)

        return jax.jit(run)

    # -------------------------- forward ------------------------------------
    def __call__(self, x):
        x = jnp.asarray(x)
        key = (tuple(x.shape), jnp.dtype(x.dtype).name)
        fn = self._compiled.get(key)
        if fn is None:
            fn = self._build(tuple(x.shape), x.dtype)
            self._compiled[key] = fn
        scalar_inputs = [jnp.asarray(v).reshape(1) for v in self._dyn_vals]
        return fn(x, *scalar_inputs)


if __name__ == "__main__":
    key = jax.random.PRNGKey(0)

    # Example mirroring typical Lambda usage, exercising extra_args / kwargs:
    #   func(x, scale, shift=...) = relu(x) * scale + shift
    # `scale` is a traced 0-d array -> routed through SMEM; `shift` is a Python
    # float -> closure constant.
    func = lambda v, scale, shift=0.0: jnp.maximum(v, 0.0) * scale + shift
    module = PallasLambda(
        func,
        extra_args=(jnp.asarray(2.0, dtype=jnp.float32),),
        extra_kwargs={"shift": 0.5},
    )

    # Case 1: NCHW [2, 4, 16, 16] (2048 elems -> 16 x 128 slab, single block,
    # grid=(1,), no padding).
    x1 = jax.random.normal(key, (2, 4, 16, 16), dtype=jnp.float32)
    y1 = jax.block_until_ready(module(x1))
    y1_ref = func(x1, 2.0, shift=0.5)
    assert y1.shape == x1.shape and y1.dtype == x1.dtype
    assert jnp.allclose(y1, y1_ref, atol=1e-6, rtol=1e-6)

    # Case 2: odd-sized input (105 elems) exercising the pad/unpad path.
    x2 = jax.random.normal(jax.random.PRNGKey(1), (3, 5, 7), dtype=jnp.float32)
    y2 = jax.block_until_ready(module(x2))
    y2_ref = func(x2, 2.0, shift=0.5)
    assert y2.shape == x2.shape and y2.dtype == x2.dtype
    assert jnp.allclose(y2, y2_ref, atol=1e-6, rtol=1e-6)

    print("KERNEL_OK")
</pallas_src>

<mosaic_0001>
module attributes {stable_mosaic.version = 11 : i64} {
  func.func @_lambda_kernel(%arg0: i32, %arg1: memref<1xf32, #tpu.memory_space<smem>>, %arg2: memref<16x128xf32, #tpu.memory_space<vmem>>, %arg3: memref<16x128xf32, #tpu.memory_space<vmem>>) attributes {dimension_semantics = [#tpu.dimension_semantics<parallel>], iteration_bounds = array<i64: 1>, scalar_prefetch = 0 : i64, scratch_operands = 0 : i64, tpu.core_type = #tpu.core_type<tc>, window_params = [{transform_indices = @transform_0, window_bounds = array<i64: 1>}, {transform_indices = @transform_1, window_bounds = array<i64: 16, 128>}, {transform_indices = @transform_2, window_bounds = array<i64: 16, 128>}]} {
    %c0 = arith.constant 0 : index
    %0 = memref.load %arg1[%c0] : memref<1xf32, #tpu.memory_space<smem>>
    %c0_0 = arith.constant 0 : index
    %c0_1 = arith.constant 0 : index
    %1 = vector.load %arg2[%c0_0, %c0_1] : memref<16x128xf32, #tpu.memory_space<vmem>>, vector<16x128xf32>
    %cst = arith.constant 0.000000e+00 : f32
    %2 = vector.broadcast %cst : f32 to vector<16x128xf32>
    %3 = arith.maximumf %1, %2 : vector<16x128xf32>
    %4 = vector.broadcast %0 : f32 to vector<16x128xf32>
    %5 = arith.mulf %3, %4 : vector<16x128xf32>
    %cst_2 = arith.constant 5.000000e-01 : f32
    %6 = vector.broadcast %cst_2 : f32 to vector<16x128xf32>
    %7 = arith.addf %5, %6 : vector<16x128xf32>
    %c0_3 = arith.constant 0 : index
    %c0_4 = arith.constant 0 : index
    %8 = vector.load %arg3[%c0_3, %c0_4] : memref<16x128xf32, #tpu.memory_space<vmem>>, vector<16x128xf32>
    tpu.vector_store %arg3[%c0_3, %c0_4], %7 {strides = array<i32>} : memref<16x128xf32, #tpu.memory_space<vmem>>, vector<16x128xf32>,
    return
  }
  func.func @transform_0(%arg0: i32) -> i32 {
    %c0_i32 = arith.constant 0 : i32
    %c0_i32_0 = arith.constant 0 : i32
    return %c0_i32 : i32
  }
  func.func @transform_1(%arg0: i32) -> (i32, i32) {
    %c0_i32 = arith.constant 0 : i32
    %c0_i32_0 = arith.constant 0 : i32
    return %arg0, %c0_i32 : i32, i32
  }
  func.func @transform_2(%arg0: i32) -> (i32, i32) {
    %c0_i32 = arith.constant 0 : i32
    %c0_i32_0 = arith.constant 0 : i32
    return %arg0, %c0_i32 : i32, i32
  }
}

</mosaic_0001>

<bundles_post_ra>
// kernel: run.1
= control target key start
LH: loop header
LB: loop body
LE: loop exit
PB: predicated region body
PF: predicated region fallthrough
CT: control target
= control target key end

     0   :  { %s58_s0 = inlined_call_operand.<no memory space> [shape: f32[1], index: 0, kind: input, shape index: {}]   ;;  %s59_s1 = inlined_call_operand.vmem [shape: f32[16,128], index: 1, kind: input, shape index: {}]   ;;  %s60_s2 = inlined_call_operand.vmem [shape: f32[16,128], index: 2, kind: output, shape index: {}]  }
   0x1   :  { %v13_v0 = vld [vmem:[%s59_s1] sm:$0xff]  ;;  %v17_v1 = vstv %s58_s0  ;;  %v14_v2 = vld [vmem:[%s59_s1 + $0x8] sm:$0xff] }
   0x2   :  { %v15_v3 = vmax.f32 %v13_v0, 0.0  ;;  %v16_v4 = vmax.f32 %v14_v2, 0.0 }
   0x4   :  { %v18_v5 = vmul.f32 %v17_v1, %v15_v3  ;;  %v19_v6 = vmul.f32 %v17_v1, %v16_v4 }
   0x6   :  { %v20_v7 = vadd.f32 0.5, %v18_v5  ;;  %v21_v8 = vadd.f32 0.5, %v19_v6 }
   0x8   :  { %22 = vst [vmem:[%s60_s2] sm:$0xff] %v20_v7 }
   0x9   :  { %23 = vst [vmem:[%s60_s2 + $0x8] sm:$0xff] %v21_v8 }

</bundles_post_ra>
